<compile_context>
chip_gen: v7x
topology: tpu7x:2x2x1
jax: 0.10.0
libtpu: 0.0.40
codegen_flags: <defaults>
</compile_context>

<pallas_src>
import jax
import jax.numpy as jnp
from jax.experimental import pallas as pl
from jax.experimental.pallas import tpu as pltpu

_HI = jax.lax.Precision.HIGHEST


def _dense_att_kernel(sl_ref, sr_ref, adj_ref, out_ref):
    # sl_ref:  (bm, 1)   per-row score (left half + all biases folded in)
    # sr_ref:  (1, bn)   per-column score (right half)
    # adj_ref: (bm, bn)  adjacency tile (int8 / any dtype)
    # out_ref: (bm, bn)
    score = sl_ref[...] + sr_ref[...]              # VPU broadcast to (bm, bn)
    sig = jax.nn.sigmoid(score)                    # EUP (slot is idle anyway)
    adj = adj_ref[...].astype(jnp.float32)         # 1 B/elem HBM read when int8
    out_ref[...] = (adj * sig).astype(out_ref.dtype)


def dense_att(x, adj, w_lin, b_lin, w_lin1, b_lin1, *,
              bm=512, bn=2048, out_dtype=jnp.float32,
              vmem_limit_bytes=40 << 20):
    """Pallas implementation of DenseAtt.forward.

    x:      (n, F) float32
    adj:    (n, n) adjacency; int8/bool 0-1 mask preferred (less HBM traffic),
            float also accepted.
    w_lin:  (F, 2F) weight of nn.Linear(2F, F)
    b_lin:  (F,)    bias of nn.Linear(2F, F)
    w_lin1: (1, F)  weight of nn.Linear(F, 1)
    b_lin1: (1,)    bias of nn.Linear(F, 1)
    returns (n, n) in out_dtype (float32 by default, matching PyTorch).
    """
    n, f = x.shape
    assert adj.shape == (n, n)

    # bool -> int8 keeps the 1-byte read path with a well-defined layout.
    if adj.dtype == jnp.bool_:
        adj = adj.astype(jnp.int8)

    # --- tile selection -----------------------------------------------------
    bm = min(bm, n)
    bn = min(bn, n)
    # Guarantee at least 2 grid steps so the 'parallel' axes can be sharded
    # over both TensorCores on megacore parts (v7x); (1,1) grids idle one TC.
    if (n // bm) * (n // bn) < 2:
        if bn >= 256 and bn % 256 == 0:
            bn //= 2
        elif bm >= 64 and bm % 64 == 0:
            bm //= 2
    # TODO(synk): support n not divisible by the tile sizes via padding/masked
    # edge tiles; the intended graph sizes are multiples of the tiles.
    assert n % bm == 0 and n % bn == 0, "n must be divisible by tile sizes"
    if jnp.dtype(adj.dtype).itemsize == 1:
        assert bm == n or bm % 32 == 0, "int8 adj tile needs bm % 32 == 0"

    # --- exact algebraic collapse of linear -> linear1 (tiny matmuls) --------
    w1 = w_lin1.reshape(f, 1)                                       # (F, 1)
    vl = jnp.dot(w_lin[:, :f].T, w1, precision=_HI)                 # (F, 1)
    vr = jnp.dot(w_lin[:, f:].T, w1, precision=_HI)                 # (F, 1)
    bias = jnp.dot(b_lin, w1.reshape(f), precision=_HI) + b_lin1[0]  # scalar
    sl = (jnp.dot(x, vl, precision=_HI) + bias).astype(jnp.float32)  # (n, 1)
    sr = jnp.dot(x, vr, precision=_HI).reshape(1, n).astype(jnp.float32)

    grid = (n // bm, n // bn)
    adj_bytes = n * n * jnp.dtype(adj.dtype).itemsize
    out_bytes = n * n * jnp.dtype(out_dtype).itemsize
    cost = pl.CostEstimate(
        flops=2 * n * n,
        transcendentals=n * n,
        bytes_accessed=adj_bytes + out_bytes + 8 * n,
    )

    return pl.pallas_call(
        _dense_att_kernel,
        out_shape=jax.ShapeDtypeStruct((n, n), out_dtype),
        grid_spec=pltpu.PrefetchScalarGridSpec(
            num_scalar_prefetch=0,
            grid=grid,
            in_specs=[
                pl.BlockSpec((bm, 1), lambda i, j: (i, 0)),    # sl rows
                pl.BlockSpec((1, bn), lambda i, j: (0, j)),    # sr cols
                pl.BlockSpec((bm, bn), lambda i, j: (i, j)),   # adj tile (int8)
            ],
            out_specs=pl.BlockSpec((bm, bn), lambda i, j: (i, j)),
        ),
        compiler_params=pltpu.CompilerParams(
            dimension_semantics=("parallel", "parallel"),
            vmem_limit_bytes=vmem_limit_bytes),
        cost_estimate=cost,
    )(sl, sr, adj)


def dense_att_reference(x, adj_f32, w_lin, b_lin, w_lin1, b_lin1):
    """Direct transcription of the PyTorch forward (for verification)."""
    n, f = x.shape
    x_left = jnp.broadcast_to(x[:, None, :], (n, n, f))
    x_right = jnp.broadcast_to(x[None, :, :], (n, n, f))
    x_cat = jnp.concatenate((x_left, x_right), axis=2)            # (n, n, 2F)
    att = jnp.matmul(x_cat, w_lin.T, precision=_HI) + b_lin       # (n, n, F)
    att = (jnp.matmul(att, w_lin1.T, precision=_HI) + b_lin1).squeeze(-1)
    att = jax.nn.sigmoid(att)
    return adj_f32 * att


if __name__ == "__main__":
    key = jax.random.PRNGKey(0)
    n = 256            # number of nodes (>= 128 so lane-dense stores are real)
    in_features = 32

    k_x, k_adj, k_w, k_b, k_w1, k_b1 = jax.random.split(key, 6)

    x = jax.random.normal(k_x, (n, in_features), dtype=jnp.float32)
    # 0/1 adjacency mask kept as int8 -> 1 B/element HBM reads in the kernel.
    adj = (jax.random.uniform(k_adj, (n, n)) > 0.5).astype(jnp.int8)

    # nn.Linear-style init: U(-1/sqrt(fan_in), +1/sqrt(fan_in))
    bound0 = 1.0 / jnp.sqrt(2.0 * in_features)
    w_lin = jax.random.uniform(k_w, (in_features, 2 * in_features),
                               minval=-bound0, maxval=bound0, dtype=jnp.float32)
    b_lin = jax.random.uniform(k_b, (in_features,),
                               minval=-bound0, maxval=bound0, dtype=jnp.float32)
    bound1 = 1.0 / jnp.sqrt(float(in_features))
    w_lin1 = jax.random.uniform(k_w1, (1, in_features),
                                minval=-bound1, maxval=bound1, dtype=jnp.float32)
    b_lin1 = jax.random.uniform(k_b1, (1,),
                                minval=-bound1, maxval=bound1, dtype=jnp.float32)

    out = dense_att(x, adj, w_lin, b_lin, w_lin1, b_lin1)
    out = jax.block_until_ready(out)

    ref = dense_att_reference(x, adj.astype(jnp.float32),
                              w_lin, b_lin, w_lin1, b_lin1)
    assert out.shape == (n, n)
    assert out.dtype == jnp.float32
    assert jnp.allclose(out, ref, atol=1e-5, rtol=1e-5), "mismatch vs reference"

    # TODO(synk): self.dropout is stored but never applied in the PyTorch
    # forward, so it is intentionally omitted here.
    print("KERNEL_OK")
</pallas_src>

<mosaic_0001>
module attributes {stable_mosaic.version = 11 : i64} {
  func.func @_dense_att_kernel(%arg0: i32, %arg1: i32, %arg2: memref<256x1xf32, #tpu.memory_space<vmem>>, %arg3: memref<1x128xf32, #tpu.memory_space<vmem>>, %arg4: memref<256x128xi8, #tpu.memory_space<vmem>>, %arg5: memref<256x128xf32, #tpu.memory_space<vmem>>) attributes {dimension_semantics = [#tpu.dimension_semantics<parallel>, #tpu.dimension_semantics<parallel>], iteration_bounds = array<i64: 1, 2>, scalar_prefetch = 0 : i64, scratch_operands = 0 : i64, tpu.core_type = #tpu.core_type<tc>, window_params = [{transform_indices = @transform_0, window_bounds = array<i64: 256, 1>}, {transform_indices = @transform_1, window_bounds = array<i64: 1, 128>}, {transform_indices = @transform_2, window_bounds = array<i64: 256, 128>}, {transform_indices = @transform_3, window_bounds = array<i64: 256, 128>}]} {
    %c0 = arith.constant 0 : index
    %c0_0 = arith.constant 0 : index
    %0 = vector.load %arg2[%c0, %c0_0] : memref<256x1xf32, #tpu.memory_space<vmem>>, vector<256x1xf32>
    %c0_1 = arith.constant 0 : index
    %c0_2 = arith.constant 0 : index
    %1 = vector.load %arg3[%c0_1, %c0_2] : memref<1x128xf32, #tpu.memory_space<vmem>>, vector<1x128xf32>
    %2 = vector.broadcast %0 : vector<256x1xf32> to vector<256x128xf32>
    %3 = vector.broadcast %1 : vector<1x128xf32> to vector<256x128xf32>
    %4 = arith.addf %2, %3 : vector<256x128xf32>
    %5 = arith.negf %4 : vector<256x128xf32>
    %6 = math.exp %5 : vector<256x128xf32>
    %cst = arith.constant 1.000000e+00 : f32
    %7 = vector.broadcast %cst : f32 to vector<256x128xf32>
    %8 = arith.addf %7, %6 : vector<256x128xf32>
    %9 = arith.divf %7, %8 : vector<256x128xf32>
    %c0_3 = arith.constant 0 : index
    %c0_4 = arith.constant 0 : index
    %10 = vector.load %arg4[%c0_3, %c0_4] : memref<256x128xi8, #tpu.memory_space<vmem>>, vector<256x128xi8>
    %11 = arith.sitofp %10 : vector<256x128xi8> to vector<256x128xf32>
    %12 = arith.mulf %11, %9 : vector<256x128xf32>
    %c0_5 = arith.constant 0 : index
    %c0_6 = arith.constant 0 : index
    %13 = vector.load %arg5[%c0_5, %c0_6] : memref<256x128xf32, #tpu.memory_space<vmem>>, vector<256x128xf32>
    tpu.vector_store %arg5[%c0_5, %c0_6], %12 {strides = array<i32>} : memref<256x128xf32, #tpu.memory_space<vmem>>, vector<256x128xf32>,
    return
  }
  func.func @transform_0(%arg0: i32, %arg1: i32) -> (i32, i32) {
    %c0_i32 = arith.constant 0 : i32
    %c0_i32_0 = arith.constant 0 : i32
    return %arg0, %c0_i32 : i32, i32
  }
  func.func @transform_1(%arg0: i32, %arg1: i32) -> (i32, i32) {
    %c0_i32 = arith.constant 0 : i32
    %c0_i32_0 = arith.constant 0 : i32
    return %c0_i32, %arg1 : i32, i32
  }
  func.func @transform_2(%arg0: i32, %arg1: i32) -> (i32, i32) {
    %c0_i32 = arith.constant 0 : i32
    return %arg0, %arg1 : i32, i32
  }
  func.func @transform_3(%arg0: i32, %arg1: i32) -> (i32, i32) {
    %c0_i32 = arith.constant 0 : i32
    return %arg0, %arg1 : i32, i32
  }
}

</mosaic_0001>

<bundles_post_ra>
// kernel: tpu_custom_call.1
= control target key start
LH: loop header
LB: loop body
LE: loop exit
PB: predicated region body
PF: predicated region fallthrough
CT: control target
= control target key end

     0   :  { %8 = vsyncpa [#allocation4], 0  ;;  %s1644_s0 = inlined_call_operand.vmem [shape: f32[256,1], index: 0, kind: input, shape index: {}]   ;;  %s1645_s1 = inlined_call_operand.vmem [shape: f32[1,256], index: 1, kind: input, shape index: {}]   ;;  %s1646_s2 = inlined_call_operand.vmem [shape: s8[256,256], index: 2, kind: input, shape index: {}]   ;;  %s1647_s3 = inlined_call_operand.hbm [shape: f32[256,256], index: 3, kind: output, shape index: {}]  }
   0x1   :  { %10 = vsyncpa [#allocation4 + $0x1], 0  ;;  %s1308_s12 = smov 0   ;;  %s1310_s13 = smov 0  }
   0x2   :  { %s1312_s14 = smov 0   ;;  %s1314_s15 = smov 0  }
   0x3   :  { %s1316_s16 = smov 0   ;;  %s1318_s17 = smov 0  }
   0x4 LB: > { %s967_s18 = sadd.s32 4294967295, %s1281_s17   ;;  %s968_s19 = sadd.s32 4294967294, %s1281_s17   ;;  %s1281_s17 = sphi %s1318_s17, %s16_s17   ;;  %s1277_s16 = sphi %s1316_s16, %s1654_s16   ;;  %s1273_s15 = sphi %s1314_s15, %s1653_s15   ;;  %s1269_s14 = sphi %s1312_s14, %s1652_s14   ;;  %s1265_s13 = sphi %s1310_s13, %s1651_s13   ;;  %s1261_s12 = sphi %s1308_s12, %s1650_s12  }
   0x5   : > { %s25_s20 = sadd.s32 1, %s1277_s16  ;;  %s89_s21 = sadd.s32 1, %s1269_s14 }
   0x6   : > { %p26_p0 = scmp.ge.s32.totalorder %s25_s20, 2  ;;  %p96_p1 = scmp.ne.s32.totalorder %s1269_s14, %s1265_s13 }
   0x7   : > { %p97_p2 = scmp.eq.s32.totalorder %s1281_s17, 0  ;;  %p128_p3 = scmp.eq.s32.totalorder %s967_s18, 1 }
   0x8   : > { %s1656_s20 = smov (%p26_p0, %s25_s20), 0  ;;  %p133_p6 = scmp.ne.s32.totalorder %s1265_s13, %s1261_s12 }
   0x9   : > { %p98_p4 = por %p97_p2, %p96_p1  ;;  %p1347_p5 = por %p128_p3, %p96_p1 }
   0xa   : > { %s85_s23 = ssub.s32 %s1277_s16, %s1656_s20  ;;  %p134_p8 = scmp.eq.s32.totalorder %s968_s19, 1 }
   0xb   : > { %p87_p7 = scmp.eq.s32.totalorder %s85_s23, 0  ;;  %p971_p10 = scmp.ge.s32.totalorder %s1281_s17, 2 }
   0xc   : > { %p1358_p9 = por %p134_p8, %p133_p6 }
   0xd   : > { %s1356_s24 = scalar_select %p87_p7, %s1269_s14, %s89_s21  }
   0xe   : > { %159 = sbr.rel (%p971_p10) target bundleno = 29 (0x1d), region = 20 }
  0x15   : > { %168 = sbr.rel (!%p98_p4) target bundleno = 29 (0x1d), region = 28  ;;  %s170_s26 = sand.u32 (%p98_p4), 1, %s1269_s14  }
  0x16   : > { %s973_s27 = sshll.u32 (%p98_p4), %s1277_s16, 3  ;;  %s972_s28 = sshll.u32 (%p98_p4), %s170_s26, 6 }
  0x17   : > { %s177_s4 = scalar_lea.vmem (%p98_p4), %s1646_s2, %s973_s27  ;;  %s172_s5 = scalar_lea.vmem (%p98_p4), [#allocation2], %s972_s28 }
  0x18   : > { %v219_v0 = vld [vmem:[%s177_s4] sm:$0xff] (%p98_p4)  ;;  %v221_v1 = vld [vmem:[%s177_s4 + $0x10] sm:$0xff] (%p98_p4) }
  0x19   : > { %v223_v2 = vld [vmem:[%s177_s4 + $0x20] sm:$0xff] (%p98_p4)  ;;  %220 = vst [vmem:[%s172_s5] sm:$0xff] (%p98_p4), %v219_v0  ;;  %222 = vst [vmem:[%s172_s5 + $0x8] sm:$0xff] (%p98_p4), %v221_v1  ;;  %v225_v3 = vld [vmem:[%s177_s4 + $0x30] sm:$0xff] (%p98_p4) }
  0x1a   : > { %224 = vst [vmem:[%s172_s5 + $0x10] sm:$0xff] (%p98_p4), %v223_v2  ;;  %v227_v4 = vld [vmem:[%s177_s4 + $0x40] sm:$0xff] (%p98_p4)  ;;  %v229_v5 = vld [vmem:[%s177_s4 + $0x50] sm:$0xff] (%p98_p4)  ;;  %226 = vst [vmem:[%s172_s5 + $0x18] sm:$0xff] (%p98_p4), %v225_v3 }
  0x1b   : > { %228 = vst [vmem:[%s172_s5 + $0x20] sm:$0xff] (%p98_p4), %v227_v4  ;;  %230 = vst [vmem:[%s172_s5 + $0x28] sm:$0xff] (%p98_p4), %v229_v5  ;;  %v231_v6 = vld [vmem:[%s177_s4 + $0x60] sm:$0xff] (%p98_p4)  ;;  %v233_v7 = vld [vmem:[%s177_s4 + $0x70] sm:$0xff] (%p98_p4) }
  0x1c   : > { %232 = vst [vmem:[%s172_s5 + $0x30] sm:$0xff] %v231_v6  ;;  %234 = vst [vmem:[%s172_s5 + $0x38] sm:$0xff] %v233_v7 }
  0x1d PF: > { %p974_p11 = scmp.ge.s32.totalorder %s1281_s17, 1  ;;  %p239_p12 = scmp.lt.s32.totalorder %s1281_s17, 3 }
  0x1f   : > { %p240_p13 = pnand %p974_p11, %p239_p12 }
  0x20   : > { %v290_v8 = vld [vmem:[%s1644_s0 + $0x10] sm:$0xff] (!%p240_p13)  ;;  %v288_v9 = vld [vmem:[%s1644_s0] sm:$0xff] (!%p240_p13)  ;;  %v1283_v10 = vmov (!%p240_p13), 0   ;;  %v291_v11 = vld [vmem:[%s1644_s0 + $0x18] sm:$0xff] (!%p240_p13)  ;;  %p283_p0 = scmp.lt.s32.totalorder (!%p240_p13), %s1273_s15, 1  ;;  %s1480_s6 = sand.u32 (!%p240_p13), 1, %s1265_s13  }
  0x21   : > { %243 = sbr.rel (%p240_p13) target bundleno = 272 (0x110), region = 66  ;;  %1074 = vset.pattern.permute.xlu1 (!%p240_p13), %v1283_v10  ;;  %1073 = vset.pattern.permute.xlu0 (!%p240_p13), %v1283_v10  ;;  %v289_v12 = vld [vmem:[%s1644_s0 + $0x8] sm:$0xff] (!%p240_p13)  ;;  %v292_v14 = vld [vmem:[%s1644_s0 + $0x20] sm:$0xff] (!%p240_p13)  ;;  %v295_v15 = vld [vmem:[%s1644_s0 + $0x38] sm:$0xff] (!%p240_p13)  ;;  %s975_s7 = sshll.u32 (!%p240_p13), %s1480_s6, 6 }
  0x22   : > { %333 = vperm.xlu1 (!%p240_p13), %1074, %v290_v8   ;;  %323 = vperm.xlu0 (!%p240_p13), %1073, %v288_v9   ;;  %v293_v13 = vld [vmem:[%s1644_s0 + $0x28] sm:$0xff] (!%p240_p13)  ;;  %v294_v16 = vld [vmem:[%s1644_s0 + $0x30] sm:$0xff] (!%p240_p13)  ;;  %v296_v18 = vld [vmem:[%s1644_s0 + $0x40] sm:$0xff] (!%p240_p13)  ;;  %s1487_s8 = scalar_lea.vmem (!%p240_p13), [#allocation2], %s975_s7  ;;  %s976_s9 = sshll.u32 (!%p240_p13), %s1480_s6, 8 }
  0x23   : > { %v297_v17 = vld [vmem:[%s1644_s0 + $0x48] sm:$0xff] (!%p240_p13)  ;;  %v299_v19 = vld [vmem:[%s1644_s0 + $0x58] sm:$0xff] (!%p240_p13)  ;;  %v298_v20 = vld [vmem:[%s1644_s0 + $0x50] sm:$0xff] (!%p240_p13)  ;;  %s1512_s10 = scalar_lea.vmem (!%p240_p13), [#allocation3], %s976_s9  ;;  %s1011_s11 = sshll.u32 (!%p240_p13), %s1273_s15, 7 }
  0x24   : > { %v301_v21 = vld [vmem:[%s1644_s0 + $0x68] sm:$0xff] (!%p240_p13)  ;;  %v300_v22 = vld [vmem:[%s1644_s0 + $0x60] sm:$0xff] (!%p240_p13)  ;;  %v303_v23 = vld [vmem:[%s1644_s0 + $0x78] sm:$0xff] (!%p240_p13)  ;;  %s863_s18 = sshll.u32 (!%p240_p13), %s1512_s10, 4  ;;  %s1591_s23 = scalar_lea.hbm (!%p240_p13), %s1647_s3, %s1011_s11  ;;  %s1594_s18 = int_to_ptr.vmem [resolvable:$true] %s863_s18 }
  0x25   : > { %v302_v24 = vld [vmem:[%s1644_s0 + $0x70] sm:$0xff] (!%p240_p13)  ;;  %v305_v25 = vld [vmem:[%s1644_s0 + $0x88] sm:$0xff] (!%p240_p13)  ;;  %v304_v26 = vld [vmem:[%s1644_s0 + $0x80] sm:$0xff] (!%p240_p13)  ;;  %s1203_s26 = scalar_lea.vmem (!%p240_p13), %s1594_s18, 4096  ;;  %s1284_s27 = smov (!%p240_p13), [#allocation3]  }
  0x26   : > { %338 = vperm.xlu1 (!%p240_p13), %1074, %v291_v11   ;;  %328 = vperm.xlu0 (!%p240_p13), %1073, %v289_v12   ;;  %v307_v27 = vld [vmem:[%s1644_s0 + $0x98] sm:$0xff] (!%p240_p13)  ;;  %v306_v28 = vld [vmem:[%s1644_s0 + $0x90] sm:$0xff] (!%p240_p13)  ;;  %v309_v29 = vld [vmem:[%s1644_s0 + $0xa8] sm:$0xff] (!%p240_p13)  ;;  %p1204_p1 = scmp.ne.s32.totalorder (!%p240_p13), %s1594_s18, %s1203_s26  ;;  %s1207_s28 = sshll.u32 (!%p240_p13), %s1284_s27, 4  ;;  %s1208_s28 = int_to_ptr.vmem [resolvable:$false] %s1207_s28 }
  0x27   : > { %v308_v30 = vld [vmem:[%s1644_s0 + $0xa0] sm:$0xff] (!%p240_p13)  ;;  %v311_v31 = vld [vmem:[%s1644_s0 + $0xb8] sm:$0xff] (!%p240_p13)  ;;  %v310_v32 = vld [vmem:[%s1644_s0 + $0xb0] sm:$0xff] (!%p240_p13)  ;;  %p1210_p4 = scmp.lt.s32.totalorder (!%p240_p13), %s1594_s18, %s1208_s28 }
  0x28   : > { %v313_v33 = vld [vmem:[%s1644_s0 + $0xc8] sm:$0xff]  ;;  %v312_v34 = vld [vmem:[%s1644_s0 + $0xc0] sm:$0xff]  ;;  %v315_v35 = vld [vmem:[%s1644_s0 + $0xd8] sm:$0xff]  ;;  %s284_s29 = scalar_select %p283_p0, %s1273_s15, 1 }
  0x29   : > { %v314_v36 = vld [vmem:[%s1644_s0 + $0xd0] sm:$0xff]  ;;  %v317_v37 = vld [vmem:[%s1644_s0 + $0xe8] sm:$0xff]  ;;  %v316_v38 = vld [vmem:[%s1644_s0 + $0xe0] sm:$0xff]  ;;  %s848_s15 = scalar_lea.sflag [#allocation4], %s1480_s6  ;;  %p1205_p2 = pnand %p1204_p1, %p1347_p5 }
  0x2a   : > { %348 = vperm.xlu1 %1074, %v293_v13   ;;  %343 = vperm.xlu0 %1073, %v292_v14   ;;  %v319_v39 = vld [vmem:[%s1644_s0 + $0xf8] sm:$0xff]  ;;  %v318_v40 = vld [vmem:[%s1644_s0 + $0xf0] sm:$0xff]  ;;  %s285_s5 = scalar_lea.vmem %s1645_s1, %s284_s29  ;;  %v1490_v4 = vld [vmem:[%s1487_s8] sm:$0xff]  ;;  %s1209_s29 = scalar_lea.vmem %s1208_s28, 8192 }
  0x2b   : > { %v1473_v41 = vld [vmem:[%s285_s5] ss:$0 sm:$0xff]  ;;  %v721_v12 = vunpack.c.2.s8 %v1490_v4  ;;  %p1206_p3 = pneg %p1205_p2  ;;  %p1211_p6 = scmp.lt.s32.totalorder %s1209_s29, %s1203_s26 }
  0x2d   : > { %p1212_p7 = por %p1211_p6, %p1210_p4 }
  0x2e   : > { %358 = vperm.xlu1 %1074, %v295_v15   ;;  %353 = vperm.xlu0 %1073, %v294_v16  }
  0x2f   : > { %p1213_p8 = pnand %p1212_p7, %p1206_p3 }
  0x32   : > { %368 = vperm.xlu1 %1074, %v297_v17   ;;  %363 = vperm.xlu0 %1073, %v296_v18  }
  0x36   : > { %378 = vperm.xlu1 %1074, %v299_v19   ;;  %373 = vperm.xlu0 %1073, %v298_v20  }
  0x3a   : > { %388 = vperm.xlu1 %1074, %v301_v21   ;;  %383 = vperm.xlu0 %1073, %v300_v22   ;;  %v719_v22 = vunpack.c.0.s8 %v1490_v4 }
  0x3e   : > { %398 = vperm.xlu1 %1074, %v303_v23   ;;  %393 = vperm.xlu0 %1073, %v302_v24   ;;  %v753_v24 = vcvt.s32.f32 %v721_v12 }
  0x42   : > { %408 = vperm.xlu1 %1074, %v305_v25   ;;  %403 = vperm.xlu0 %1073, %v304_v26  }
  0x46   : > { %418 = vperm.xlu1 %1074, %v307_v27   ;;  %413 = vperm.xlu0 %1073, %v306_v28   ;;  %v722_v27 = vunpack.c.3.s8 %v1490_v4 }
  0x4a   : > { %428 = vperm.xlu1 %1074, %v309_v29   ;;  %423 = vperm.xlu0 %1073, %v308_v30  }
  0x4e   : > { %438 = vperm.xlu1 %1074, %v311_v31   ;;  %433 = vperm.xlu0 %1073, %v310_v32   ;;  %v1501_v32 = vld [vmem:[%s1487_s8 + $0x8] sm:$0xff] }
  0x52   : > { %448 = vperm.xlu1 %1074, %v313_v33   ;;  %443 = vperm.xlu0 %1073, %v312_v34  }
  0x56   : > { %458 = vperm.xlu1 %1074, %v315_v35   ;;  %453 = vperm.xlu0 %1073, %v314_v36   ;;  %v751_v36 = vcvt.s32.f32 %v719_v22 }
  0x5a   : > { %468 = vperm.xlu1 %1074, %v317_v37   ;;  %463 = vperm.xlu0 %1073, %v316_v38   ;;  %v720_v37 = vunpack.c.1.s8 %v1490_v4 }
  0x5e   : > { %478 = vperm.xlu1 %1074, %v319_v39   ;;  %473 = vperm.xlu0 %1073, %v318_v40  }
  0xa1   : > { %v334_v42 = vpop.permute.xlu1 %333  ;;  %v324_v43 = vpop.permute.xlu0 %323 }
  0xa2   : > { %v489_v44 = vadd.f32 %v1473_v41, %v334_v42  ;;  %v487_v45 = vadd.f32 %v1473_v41, %v324_v43  ;;  %v754_v43 = vcvt.s32.f32 %v722_v27 }
  0xa4   : > { %v980_v46 = vmul.f32 -1.442695, %v489_v44  ;;  %v978_v47 = vmul.f32 -1.442695, %v487_v45  ;;  %v724_v44 = vunpack.c.1.s8 %v1501_v32 }
  0xa5   : > { %v339_v48 = vpop.permute.xlu1 %338  ;;  %v329_v49 = vpop.permute.xlu0 %328 }
  0xa6   : > { %1075 = vpow2.f32 %v980_v46  ;;  %v490_v50 = vadd.f32 %v1473_v41, %v339_v48  ;;  %v488_v51 = vadd.f32 %v1473_v41, %v329_v49 }
  0xa7   : > { %1077 = vpow2.f32 %v978_v47 }
  0xa8   : > { %v981_v52 = vmul.f32 -1.442695, %v490_v50  ;;  %v979_v53 = vmul.f32 -1.442695, %v488_v51 }
  0xa9   : > { %v349_v54 = vpop.permute.xlu1 %348  ;;  %v344_v55 = vpop.permute.xlu0 %343 }
  0xaa   : > { %1079 = vpow2.f32 %v981_v52  ;;  %v492_v56 = vadd.f32 %v1473_v41, %v349_v54  ;;  %v491_v57 = vadd.f32 %v1473_v41, %v344_v55  ;;  %v752_v54 = vcvt.s32.f32 %v720_v37 }
  0xab   : > { %1081 = vpow2.f32 %v979_v53  ;;  %v723_v55 = vunpack.c.0.s8 %v1501_v32 }
  0xac   : > { %v983_v58 = vmul.f32 -1.442695, %v492_v56  ;;  %v982_v59 = vmul.f32 -1.442695, %v491_v57 }
  0xad   : > { %v359_v60 = vpop.permute.xlu1 %358  ;;  %v354_v61 = vpop.permute.xlu0 %353 }
  0xae   : > { %1083 = vpow2.f32 %v983_v58  ;;  %v494_v62 = vadd.f32 %v1473_v41, %v359_v60  ;;  %v493_v63 = vadd.f32 %v1473_v41, %v354_v61  ;;  %v756_v60 = vcvt.s32.f32 %v724_v44 }
  0xaf   : > { %1085 = vpow2.f32 %v982_v59  ;;  %v726_v61 = vunpack.c.3.s8 %v1501_v32 }
  0xb0   : > { %v1076_v0 = vpop.eup %1075  ;;  %v985_v1 = vmul.f32 -1.442695, %v494_v62  ;;  %v984_v5 = vmul.f32 -1.442695, %v493_v63  ;;  %v1518_v63 = vld [vmem:[%s1487_s8 + $0x10] sm:$0xff] }
  0xb1   : > { %v1078_v2 = vpop.eup %1077  ;;  %v617_v3 = vadd.f32 1.0, %v1076_v0  ;;  %v369_v6 = vpop.permute.xlu1 %368  ;;  %v728_v12 = vunpack.c.1.s8 %v1518_v63 }
  0xb2   : > { %v364_v7 = vpop.permute.xlu0 %363  ;;  %v615_v8 = vadd.f32 1.0, %v1078_v2  ;;  %1087 = vpow2.f32 %v985_v1  ;;  %v496_v9 = vadd.f32 %v1473_v41, %v369_v6 }
  0xb3   : > { %v495_v10 = vadd.f32 %v1473_v41, %v364_v7  ;;  %1089 = vrcp.f32 %v617_v3 }
  0xb4   : > { %v1080_v11 = vpop.eup %1079  ;;  %1091 = vrcp.f32 %v615_v8  ;;  %v987_v13 = vmul.f32 -1.442695, %v496_v9  ;;  %v755_v9 = vcvt.s32.f32 %v723_v55 }
  0xb5   : > { %v1082_v14 = vpop.eup %1081  ;;  %v618_v15 = vadd.f32 1.0, %v1080_v11  ;;  %1093 = vpow2.f32 %v984_v5  ;;  %v986_v16 = vmul.f32 -1.442695, %v495_v10  ;;  %v379_v17 = vpop.permute.xlu1 %378  ;;  %v725_v10 = vunpack.c.2.s8 %v1501_v32 }
  0xb6   : > { %v374_v18 = vpop.permute.xlu0 %373  ;;  %v616_v19 = vadd.f32 1.0, %v1082_v14  ;;  %1095 = vpow2.f32 %v987_v13  ;;  %v498_v20 = vadd.f32 %v1473_v41, %v379_v17 }
  0xb7   : > { %v497_v21 = vadd.f32 %v1473_v41, %v374_v18  ;;  %1097 = vrcp.f32 %v618_v15  ;;  %v757_v27 = vcvt.s32.f32 %v725_v10 }
  0xb8   : > { %v1084_v23 = vpop.eup %1083  ;;  %1099 = vrcp.f32 %v616_v19  ;;  %v989_v25 = vmul.f32 -1.442695, %v498_v20 }
  0xb9   : > { %v1086_v26 = vpop.eup %1085  ;;  %v620_v28 = vadd.f32 1.0, %v1084_v23  ;;  %1101 = vpow2.f32 %v986_v16  ;;  %v988_v29 = vmul.f32 -1.442695, %v497_v21  ;;  %v389_v30 = vpop.permute.xlu1 %388  ;;  %v758_v16 = vcvt.s32.f32 %v726_v61 }
  0xba   : > { %v384_v31 = vpop.permute.xlu0 %383  ;;  %v619_v33 = vadd.f32 1.0, %v1086_v26  ;;  %1103 = vpow2.f32 %v989_v25  ;;  %v500_v34 = vadd.f32 %v1473_v41, %v389_v30  ;;  %v760_v30 = vcvt.s32.f32 %v728_v12 }
  0xbb   : > { %v499_v35 = vadd.f32 %v1473_v41, %v384_v31  ;;  %1105 = vrcp.f32 %v620_v28  ;;  %v727_v28 = vunpack.c.0.s8 %v1518_v63 }
  0xbc   : > { %v1088_v38 = vpop.eup %1087  ;;  %1107 = vrcp.f32 %v619_v33  ;;  %v991_v39 = vmul.f32 -1.442695, %v500_v34  ;;  %v730_v34 = vunpack.c.3.s8 %v1518_v63 }
  0xbd   : > { %v990_v40 = vmul.f32 -1.442695, %v499_v35  ;;  %v1090_v42 = vpop.eup %1089  ;;  %v622_v45 = vadd.f32 1.0, %v1088_v38  ;;  %1109 = vpow2.f32 %v988_v29  ;;  %v399_v46 = vpop.permute.xlu1 %398 }
  0xbe   : > { %v394_v47 = vpop.permute.xlu0 %393  ;;  %v1092_v48 = vpop.eup %1091  ;;  %v785_v49 = vmul.f32 %v1090_v42, %v753_v24  ;;  %1111 = vpow2.f32 %v991_v39  ;;  %v502_v50 = vadd.f32 %v1473_v41, %v399_v46  ;;  %v1533_v42 = vld [vmem:[%s1487_s8 + $0x18] sm:$0xff] }
  0xbf   : > { %v501_v51 = vadd.f32 %v1473_v41, %v394_v47  ;;  %v1094_v52 = vpop.eup %1093  ;;  %v783_v53 = vmul.f32 %v1092_v48, %v751_v36  ;;  %1113 = vrcp.f32 %v622_v45  ;;  %v759_v45 = vcvt.s32.f32 %v727_v28 }
  0xc0   : > { %v1096_v56 = vpop.eup %1095  ;;  %817 = vst [vmem:[%s1512_s10 + $0x10] sm:$0xff] %v785_v49  ;;  %v621_v57 = vadd.f32 1.0, %v1094_v52  ;;  %1115 = vpow2.f32 %v990_v40  ;;  %v993_v58 = vmul.f32 -1.442695, %v502_v50  ;;  %v729_v48 = vunpack.c.2.s8 %v1518_v63 }
  0xc1   : > { %v1098_v59 = vpop.eup %1097  ;;  %815 = vst [vmem:[%s1512_s10] sm:$0xff] %v783_v53  ;;  %v624_v62 = vadd.f32 1.0, %v1096_v56  ;;  %v992_v0 = vmul.f32 -1.442695, %v501_v51  ;;  %v409_v1 = vpop.permute.xlu1 %408  ;;  %v762_v53 = vcvt.s32.f32 %v730_v34 }
  0xc2   : > { %v404_v2 = vpop.permute.xlu0 %403  ;;  %v1100_v3 = vpop.eup %1099  ;;  %v786_v4 = vmul.f32 %v1098_v59, %v754_v43  ;;  %1117 = vrcp.f32 %v621_v57  ;;  %v504_v5 = vadd.f32 %v1473_v41, %v409_v1 }
  0xc3   : > { %v503_v6 = vadd.f32 %v1473_v41, %v404_v2  ;;  %v1102_v7 = vpop.eup %1101  ;;  %v784_v8 = vmul.f32 %v1100_v3, %v752_v54  ;;  %1119 = vrcp.f32 %v624_v62  ;;  %v732_v54 = vunpack.c.1.s8 %v1533_v42 }
  0xc4   : > { %v1104_v11 = vpop.eup %1103  ;;  %818 = vst [vmem:[%s1512_s10 + $0x18] sm:$0xff] %v786_v4  ;;  %v623_v13 = vadd.f32 1.0, %v1102_v7  ;;  %1121 = vpow2.f32 %v993_v58  ;;  %v995_v14 = vmul.f32 -1.442695, %v504_v5  ;;  %v731_v62 = vunpack.c.0.s8 %v1533_v42 }
  0xc5   : > { %v1106_v15 = vpop.eup %1105  ;;  %816 = vst [vmem:[%s1512_s10 + $0x8] sm:$0xff] %v784_v8  ;;  %v626_v17 = vadd.f32 1.0, %v1104_v11  ;;  %1123 = vpow2.f32 %v992_v0  ;;  %v994_v18 = vmul.f32 -1.442695, %v503_v6  ;;  %v419_v19 = vpop.permute.xlu1 %418  ;;  %v761_v6 = vcvt.s32.f32 %v729_v48 }
  0xc6   : > { %v414_v20 = vpop.permute.xlu0 %413  ;;  %v1108_v21 = vpop.eup %1107  ;;  %v788_v22 = vmul.f32 %v1106_v15, %v756_v60  ;;  %1125 = vrcp.f32 %v623_v13  ;;  %v506_v23 = vadd.f32 %v1473_v41, %v419_v19  ;;  %v764_v7 = vcvt.s32.f32 %v732_v54  ;;  %v1551_v19 = vld [vmem:[%s1487_s8 + $0x20] sm:$0xff] }
  0xc7   : > { %v505_v24 = vadd.f32 %v1473_v41, %v414_v20  ;;  %v1110_v25 = vpop.eup %1109  ;;  %v787_v26 = vmul.f32 %v1108_v21, %v755_v9  ;;  %1127 = vrcp.f32 %v626_v17  ;;  %v763_v15 = vcvt.s32.f32 %v731_v62 }
  0xc8   : > { %v1112_v29 = vpop.eup %1111  ;;  %820 = vst [vmem:[%s1512_s10 + $0x28] sm:$0xff] %v788_v22  ;;  %v625_v31 = vadd.f32 1.0, %v1110_v25  ;;  %1129 = vpow2.f32 %v995_v14  ;;  %v997_v32 = vmul.f32 -1.442695, %v506_v23  ;;  %v733_v25 = vunpack.c.2.s8 %v1533_v42 }
  0xc9   : > { %v1114_v33 = vpop.eup %1113  ;;  %819 = vst [vmem:[%s1512_s10 + $0x20] sm:$0xff] %v787_v26  ;;  %v628_v35 = vadd.f32 1.0, %v1112_v29  ;;  %1131 = vpow2.f32 %v994_v18  ;;  %v996_v36 = vmul.f32 -1.442695, %v505_v24  ;;  %v429_v37 = vpop.permute.xlu1 %428  ;;  %v736_v34 = vunpack.c.1.s8 %v1551_v19 }
  0xca   : > { %v424_v38 = vpop.permute.xlu0 %423  ;;  %v1116_v39 = vpop.eup %1115  ;;  %v790_v40 = vmul.f32 %v1114_v33, %v758_v16  ;;  %1133 = vrcp.f32 %v625_v31  ;;  %v508_v43 = vadd.f32 %v1473_v41, %v429_v37  ;;  %v734_v16 = vunpack.c.3.s8 %v1533_v42 }
  0xcb   : > { %v507_v44 = vadd.f32 %v1473_v41, %v424_v38  ;;  %1135 = vrcp.f32 %v628_v35  ;;  %v627_v46 = vadd.f32 1.0, %v1116_v39  ;;  %v735_v38 = vunpack.c.0.s8 %v1551_v19 }
  0xcc   : > { %v1118_v47 = vpop.eup %1117  ;;  %822 = vst [vmem:[%s1512_s10 + $0x38] sm:$0xff] %v790_v40  ;;  %1137 = vpow2.f32 %v997_v32  ;;  %v999_v49 = vmul.f32 -1.442695, %v508_v43  ;;  %v766_v33 = vcvt.s32.f32 %v734_v16  ;;  %v765_v42 = vcvt.s32.f32 %v733_v25 }
  0xcd   : > { %v998_v50 = vmul.f32 -1.442695, %v507_v44  ;;  %v1120_v51 = vpop.eup %1119  ;;  %v789_v52 = vmul.f32 %v1118_v47, %v757_v27  ;;  %1139 = vrcp.f32 %v627_v46  ;;  %v439_v55 = vpop.permute.xlu1 %438  ;;  %v737_v62 = vunpack.c.2.s8 %v1551_v19 }
  0xce   : > { %v434_v56 = vpop.permute.xlu0 %433  ;;  %v1122_v57 = vpop.eup %1121  ;;  %v792_v58 = vmul.f32 %v1120_v51, %v760_v30  ;;  %1141 = vpow2.f32 %v996_v36  ;;  %v510_v59 = vadd.f32 %v1473_v41, %v439_v55 }
  0xcf   : > { %v509_v60 = vadd.f32 %v1473_v41, %v434_v56  ;;  %v1124_v61 = vpop.eup %1123  ;;  %821 = vst [vmem:[%s1512_s10 + $0x30] sm:$0xff] %v789_v52  ;;  %v630_v63 = vadd.f32 1.0, %v1122_v57  ;;  %1143 = vpow2.f32 %v999_v49  ;;  %v768_v52 = vcvt.s32.f32 %v736_v34 }
  0xd0   : > { %v1126_v0 = vpop.eup %1125  ;;  %824 = vst [vmem:[%s1512_s10 + $0x48] sm:$0xff] %v792_v58  ;;  %v629_v1 = vadd.f32 1.0, %v1124_v61  ;;  %1145 = vpow2.f32 %v998_v50  ;;  %v1001_v2 = vmul.f32 -1.442695, %v510_v59  ;;  %v767_v57 = vcvt.s32.f32 %v735_v38  ;;  %v716_v58 = vld [vmem:[%s1487_s8 + $0x28] sm:$0xff] }
  0xd1   : > { %v1000_v3 = vmul.f32 -1.442695, %v509_v60  ;;  %v1128_v4 = vpop.eup %1127  ;;  %v791_v5 = vmul.f32 %v1126_v0, %v759_v45  ;;  %1147 = vrcp.f32 %v630_v63  ;;  %v449_v8 = vpop.permute.xlu1 %448 }
  0xd2   : > { %v444_v9 = vpop.permute.xlu0 %443  ;;  %v1130_v10 = vpop.eup %1129  ;;  %v794_v11 = vmul.f32 %v1128_v4, %v762_v53  ;;  %1149 = vrcp.f32 %v629_v1  ;;  %v512_v12 = vadd.f32 %v1473_v41, %v449_v8  ;;  %v738_v53 = vunpack.c.3.s8 %v1551_v19 }
  0xd3   : > { %v511_v13 = vadd.f32 %v1473_v41, %v444_v9  ;;  %v1132_v14 = vpop.eup %1131  ;;  %823 = vst [vmem:[%s1512_s10 + $0x40] sm:$0xff] %v791_v5  ;;  %v632_v17 = vadd.f32 1.0, %v1130_v10  ;;  %1151 = vpow2.f32 %v1001_v2  ;;  %v740_v8 = vunpack.c.1.s8 %v716_v58 }
  0xd4   : > { %v1134_v18 = vpop.eup %1133  ;;  %826 = vst [vmem:[%s1512_s10 + $0x58] sm:$0xff] %v794_v11  ;;  %v631_v20 = vadd.f32 1.0, %v1132_v14  ;;  %1153 = vpow2.f32 %v1000_v3  ;;  %v1003_v21 = vmul.f32 -1.442695, %v512_v12  ;;  %v739_v12 = vunpack.c.0.s8 %v716_v58 }
  0xd5   : > { %v1002_v22 = vmul.f32 -1.442695, %v511_v13  ;;  %v1136_v23 = vpop.eup %1135  ;;  %v793_v24 = vmul.f32 %v1134_v18, %v761_v6  ;;  %1155 = vrcp.f32 %v632_v17  ;;  %v459_v26 = vpop.permute.xlu1 %458 }
  0xd6   : > { %v454_v27 = vpop.permute.xlu0 %453  ;;  %v1138_v28 = vpop.eup %1137  ;;  %v796_v29 = vmul.f32 %v1136_v23, %v764_v7  ;;  %1157 = vrcp.f32 %v631_v20  ;;  %v514_v30 = vadd.f32 %v1473_v41, %v459_v26  ;;  %v770_v7 = vcvt.s32.f32 %v738_v53 }
  0xd7   : > { %v513_v31 = vadd.f32 %v1473_v41, %v454_v27  ;;  %v1140_v32 = vpop.eup %1139  ;;  %825 = vst [vmem:[%s1512_s10 + $0x50] sm:$0xff] %v793_v24  ;;  %v634_v35 = vadd.f32 1.0, %v1138_v28  ;;  %1159 = vpow2.f32 %v1003_v21  ;;  %v772_v20 = vcvt.s32.f32 %v740_v8  ;;  %v717_v27 = vld [vmem:[%s1487_s8 + $0x30] sm:$0xff] }
  0xd8   : > { %v1142_v36 = vpop.eup %1141  ;;  %828 = vst [vmem:[%s1512_s10 + $0x68] sm:$0xff] %v796_v29  ;;  %v795_v37 = vmul.f32 %v1140_v32, %v763_v15  ;;  %1161 = vpow2.f32 %v1002_v22  ;;  %v1005_v39 = vmul.f32 -1.442695, %v514_v30  ;;  %v742_v21 = vunpack.c.3.s8 %v716_v58 }
  0xd9   : > { %v1144_v40 = vpop.eup %1143  ;;  %1163 = vrcp.f32 %v634_v35  ;;  %v633_v43 = vadd.f32 1.0, %v1142_v36  ;;  %v1004_v44 = vmul.f32 -1.442695, %v513_v31  ;;  %v469_v45 = vpop.permute.xlu1 %468  ;;  %v771_v25 = vcvt.s32.f32 %v739_v12 }
  0xda   : > { %v464_v46 = vpop.permute.xlu0 %463  ;;  %v1146_v47 = vpop.eup %1145  ;;  %827 = vst [vmem:[%s1512_s10 + $0x60] sm:$0xff] %v795_v37  ;;  %v636_v48 = vadd.f32 1.0, %v1144_v40  ;;  %1165 = vpow2.f32 %v1005_v39  ;;  %v516_v49 = vadd.f32 %v1473_v41, %v469_v45  ;;  %v741_v26 = vunpack.c.2.s8 %v716_v58 }
  0xdb   : > { %v515_v50 = vadd.f32 %v1473_v41, %v464_v46  ;;  %v1148_v51 = vpop.eup %1147  ;;  %1167 = vrcp.f32 %v633_v43  ;;  %v635_v54 = vadd.f32 1.0, %v1146_v47  ;;  %v774_v34 = vcvt.s32.f32 %v742_v21 }
  0xdc   : > { %v1150_v55 = vpop.eup %1149  ;;  %v798_v56 = vmul.f32 %v1148_v51, %v766_v33  ;;  %1169 = vrcp.f32 %v636_v48  ;;  %v1007_v59 = vmul.f32 -1.442695, %v516_v49  ;;  %v744_v35 = vunpack.c.1.s8 %v717_v27 }
  0xdd   : > { %v1152_v60 = vpop.eup %1151  ;;  %v797_v61 = vmul.f32 %v1150_v55, %v765_v42  ;;  %1171 = vrcp.f32 %v635_v54  ;;  %v1006_v63 = vmul.f32 -1.442695, %v515_v50  ;;  %v479_v0 = vpop.permute.xlu1 %478  ;;  %v773_v38 = vcvt.s32.f32 %v741_v26 }
  0xde   : > { %v474_v1 = vpop.permute.xlu0 %473  ;;  %v1154_v2 = vpop.eup %1153  ;;  %830 = vst [vmem:[%s1512_s10 + $0x78] sm:$0xff] %v798_v56  ;;  %v638_v3 = vadd.f32 1.0, %v1152_v60  ;;  %1173 = vpow2.f32 %v1004_v44  ;;  %v518_v4 = vadd.f32 %v1473_v41, %v479_v0  ;;  %v743_v39 = vunpack.c.0.s8 %v717_v27 }
  0xdf   : > { %v517_v5 = vadd.f32 %v1473_v41, %v474_v1  ;;  %v1156_v6 = vpop.eup %1155  ;;  %829 = vst [vmem:[%s1512_s10 + $0x70] sm:$0xff] %v797_v61  ;;  %v637_v9 = vadd.f32 1.0, %v1154_v2  ;;  %1175 = vpow2.f32 %v1007_v59  ;;  %v769_v41 = vcvt.s32.f32 %v737_v62 }
  0xe0   : > { %v1158_v10 = vpop.eup %1157  ;;  %v800_v11 = vmul.f32 %v1156_v6, %v768_v52  ;;  %1177 = vrcp.f32 %v638_v3  ;;  %v1009_v13 = vmul.f32 -1.442695, %v518_v4  ;;  %v746_v44 = vunpack.c.3.s8 %v717_v27  ;;  %v718_v52 = vld [vmem:[%s1487_s8 + $0x38] sm:$0xff] }
  0xe1   : > { %v1160_v14 = vpop.eup %1159  ;;  %v799_v15 = vmul.f32 %v1158_v10, %v767_v57  ;;  %1179 = vrcp.f32 %v637_v9  ;;  %v1008_v18 = vmul.f32 -1.442695, %v517_v5  ;;  %v776_v48 = vcvt.s32.f32 %v744_v35 }
  0xe2   : > { %v1162_v16 = vpop.eup %1161  ;;  %832 = vst [vmem:[%s1512_s10 + $0x88] sm:$0xff] %v800_v11  ;;  %v640_v17 = vadd.f32 1.0, %v1160_v14  ;;  %1181 = vpow2.f32 %v1006_v63  ;;  %v775_v51 = vcvt.s32.f32 %v743_v39  ;;  %v778_v56 = vcvt.s32.f32 %v746_v44 }
  0xe3   : > { %v1164_v19 = vpop.eup %1163  ;;  %831 = vst [vmem:[%s1512_s10 + $0x80] sm:$0xff] %v799_v15  ;;  %v639_v22 = vadd.f32 1.0, %v1162_v16  ;;  %1183 = vpow2.f32 %v1009_v13  ;;  %v745_v57 = vunpack.c.2.s8 %v717_v27  ;;  %v748_v61 = vunpack.c.1.s8 %v718_v52 }
  0xe4   : > { %v1166_v23 = vpop.eup %1165  ;;  %v802_v24 = vmul.f32 %v1164_v19, %v770_v7  ;;  %1185 = vrcp.f32 %v640_v17  ;;  %v747_v4 = vunpack.c.0.s8 %v718_v52  ;;  %v750_v6 = vunpack.c.3.s8 %v718_v52 }
  0xe5   : > { %v1168_v28 = vpop.eup %1167  ;;  %1187 = vrcp.f32 %v639_v22  ;;  %v642_v29 = vadd.f32 1.0, %v1166_v23  ;;  %v777_v3 = vcvt.s32.f32 %v745_v57  ;;  %v780_v5 = vcvt.s32.f32 %v748_v61 }
  0xe6   : > { %v1170_v30 = vpop.eup %1169  ;;  %834 = vst [vmem:[%s1512_s10 + $0x98] sm:$0xff] %v802_v24  ;;  %v801_v31 = vmul.f32 %v1168_v28, %v769_v41  ;;  %1189 = vpow2.f32 %v1008_v18  ;;  %v779_v10 = vcvt.s32.f32 %v747_v4  ;;  %v749_v11 = vunpack.c.2.s8 %v718_v52 }
  0xe7   : > { %v1172_v32 = vpop.eup %1171  ;;  %v804_v33 = vmul.f32 %v1170_v30, %v772_v20  ;;  %1191 = vrcp.f32 %v642_v29  ;;  %v782_v13 = vcvt.s32.f32 %v750_v6 }
  0xe8   : > { %v1174_v36 = vpop.eup %1173  ;;  %833 = vst [vmem:[%s1512_s10 + $0x90] sm:$0xff] %v801_v31  ;;  %v803_v37 = vmul.f32 %v1172_v32, %v771_v25  ;;  %v781_v41 = vcvt.s32.f32 %v749_v11 }
  0xe9   : > { %v1176_v40 = vpop.eup %1175  ;;  %836 = vst [vmem:[%s1512_s10 + $0xa8] sm:$0xff] %v804_v33  ;;  %v641_v42 = vadd.f32 1.0, %v1174_v36 }
  0xea   : > { %v1178_v43 = vpop.eup %1177  ;;  %835 = vst [vmem:[%s1512_s10 + $0xa0] sm:$0xff] %v803_v37  ;;  %v644_v45 = vadd.f32 1.0, %v1176_v40 }
  0xeb   : > { %v1180_v46 = vpop.eup %1179  ;;  %v806_v47 = vmul.f32 %v1178_v43, %v774_v34  ;;  %1193 = vrcp.f32 %v641_v42 }
  0xec   : > { %v1182_v49 = vpop.eup %1181  ;;  %v805_v50 = vmul.f32 %v1180_v46, %v773_v38  ;;  %1195 = vrcp.f32 %v644_v45 }
  0xed   : > { %v1184_v53 = vpop.eup %1183  ;;  %838 = vst [vmem:[%s1512_s10 + $0xb8] sm:$0xff] %v806_v47  ;;  %v643_v54 = vadd.f32 1.0, %v1182_v49 }
  0xee   : > { %v1186_v55 = vpop.eup %1185  ;;  %837 = vst [vmem:[%s1512_s10 + $0xb0] sm:$0xff] %v805_v50  ;;  %v646_v58 = vadd.f32 1.0, %v1184_v53 }
  0xef   : > { %v1188_v59 = vpop.eup %1187  ;;  %v808_v60 = vmul.f32 %v1186_v55, %v776_v48  ;;  %1197 = vrcp.f32 %v643_v54 }
  0xf0   : > { %v1190_v62 = vpop.eup %1189  ;;  %v807_v63 = vmul.f32 %v1188_v59, %v775_v51  ;;  %1199 = vrcp.f32 %v646_v58 }
  0xf1   : > { %v1192_v0 = vpop.eup %1191  ;;  %840 = vst [vmem:[%s1512_s10 + $0xc8] sm:$0xff] %v808_v60  ;;  %v645_v1 = vadd.f32 1.0, %v1190_v62 }
  0xf2   : > { %839 = vst [vmem:[%s1512_s10 + $0xc0] sm:$0xff] %v807_v63  ;;  %v810_v2 = vmul.f32 %v1192_v0, %v778_v56 }
  0xf3   : > { %1201 = vrcp.f32 %v645_v1 }
  0xf4   : > { %842 = vst [vmem:[%s1512_s10 + $0xd8] sm:$0xff] %v810_v2 }
  0xf5   : > { %v1194_v7 = vpop.eup %1193 }
  0xf6   : > { %v1196_v8 = vpop.eup %1195  ;;  %v809_v9 = vmul.f32 %v1194_v7, %v777_v3 }
  0xf7   : > { %v812_v12 = vmul.f32 %v1196_v8, %v780_v5 }
  0xf8   : > { %841 = vst [vmem:[%s1512_s10 + $0xd0] sm:$0xff] %v809_v9 }
  0xf9   : > { %v1198_v14 = vpop.eup %1197  ;;  %844 = vst [vmem:[%s1512_s10 + $0xe8] sm:$0xff] %v812_v12 }
  0xfa   : > { %v1200_v15 = vpop.eup %1199  ;;  %v811_v16 = vmul.f32 %v1198_v14, %v779_v10 }
  0xfb   : > { %v814_v17 = vmul.f32 %v1200_v15, %v782_v13 }
  0xfc   : > { %843 = vst [vmem:[%s1512_s10 + $0xe0] sm:$0xff] %v811_v16 }
  0xfd   : > { %v1202_v18 = vpop.eup %1201  ;;  %846 = vst [vmem:[%s1512_s10 + $0xf8] sm:$0xff] %v814_v17 }
  0xfe   : > { %v813_v19 = vmul.f32 %v1202_v18, %v781_v41 }
 0x100   : > { %845 = vst [vmem:[%s1512_s10 + $0xf0] sm:$0xff] %v813_v19 }
 0x101   : > { %1216 = shalt.err (!%p1213_p8)
}
 0x102   : > { %s1217_s30 = scalar_lea.hbm %s1591_s23, 4096  ;;  %s1221_s7 = scalar_lea.hbm %s1647_s3, 8192 }
 0x103   : > { %p1218_p11 = scmp.ne.s32.totalorder %s1591_s23, %s1217_s30  ;;  %p1222_p0 = scmp.lt.u32.totalorder %s1591_s23, %s1647_s3 }
 0x104   : > { %p1223_p1 = scmp.lt.u32.totalorder %s1221_s7, %s1217_s30  ;;  %p1225_p3 = scmp.lt.u32.totalorder %s1217_s30, %s1591_s23 }
 0x105   : > { %p1219_p12 = pnand %p1218_p11, %p1347_p5 }
 0x106   : > { %p1224_p2 = por %p1223_p1, %p1222_p0 }
 0x107   : > { %p1220_p13 = pneg %p1219_p12 }
 0x108   : > { %p1226_p4 = por %p1225_p3, %p1224_p2 }
 0x10a   : > { %p1227_p6 = pnand %p1226_p4, %p1220_p13 }
 0x10c   : > { %1230 = shalt.err (!%p1227_p6)
}
 0x10d   : > { %s1285_s10 = smov 128   ;;  %s1286_s11 = smov 256  }
 0x10e   : > { %s1287_s19 = smov 8  }
 0x10f   : > { %1014 = dma.vmem_to_hbm [thread:$0]  (%p1347_p5), %s1594_s18, 4096, %s1591_s23, %s848_s15, %s1285_s10, %s1286_s11, %s1287_s19  }
 0x110 PF: > { %s878_s21 = sand.u32 1, %s1261_s12   ;;  %p1017_p7 = pnand %p971_p10, %p1358_p9 }
 0x111   : > { %s879_s26 = scalar_lea.sflag [#allocation4], %s878_s21 }
 0x112   : > { %1256 = dma.done.wait (!%p1017_p7), %s879_s26, 4096  }
 0x113   : > { %1258 = vsyncadd (!%p1017_p7), %s879_s26, 4294963200  ;;  %s16_s17 = sadd.s32 1, %s1281_s17   ;;  %s1650_s12 = smov %s1265_s13 }
 0x114   : > { %p13_p8 = scmp.ge.s32.totalorder %s16_s17, 4   ;;  %s1651_s13 = smov %s1269_s14 }
 0x115   : > { %s1652_s14 = smov %s1356_s24  ;;  %s1653_s15 = smov %s1277_s16 }
 0x116   : > { %s1654_s16 = smov %s1656_s20  ;;  %15 = sbr.rel (!%p13_p8) target bundleno = 4 (0x4), region = 116 }
 0x11d   :  { %884 = vsyncpa [#allocation4], 1 }
 0x11e   :  { %886 = vsyncpa [#allocation4 + $0x1], 1 }

</bundles_post_ra>
